<compile_context>
chip_gen: v6e
topology: v6e:2x2x1
jax: 0.10.0
libtpu: 0.0.40
codegen_flags: <defaults>
</compile_context>

<pallas_src>
import functools

import jax
import jax.numpy as jnp
import numpy as np
from jax import lax
from jax.experimental import pallas as pl
from jax.experimental.pallas import tpu as pltpu


def _round_up(x, m):
    return (x + m - 1) // m * m


# ---------------------------------------------------------------------------
# One-time probe of the hardware rotate direction so the tap shifts are robust
# to the pltpu.roll sign convention (expected to match jnp.roll).
# ---------------------------------------------------------------------------
def _probe_roll_direction():
    def k(x_ref, o_ref):
        o_ref[...] = pltpu.roll(x_ref[...], 1, axis=1)

    x = np.arange(8 * 128, dtype=np.float32).reshape(8, 128)
    out = np.asarray(
        pl.pallas_call(k, out_shape=jax.ShapeDtypeStruct((8, 128), jnp.float32))(
            jnp.asarray(x)))
    # True  -> element i moves to i+shift (jnp.roll convention)
    return bool(out[0, 1] == x[0, 0])


_ROLL_IS_FORWARD = _probe_roll_direction()


# ---------------------------------------------------------------------------
# Pass 1: convolution as tap-shifted matmuls (implicit im2col).
# ---------------------------------------------------------------------------
def _conv_taps(x_ref, w_ref, offsets, n_lanes):
    """acc[co, i] = sum_taps W_tap[co, :] @ window[:, i + off_tap]."""
    win = x_ref[0, 0]                      # (C_pad, Twin): tile + halo, resident
    twin = win.shape[-1]
    acc = None
    for j, off in enumerate(offsets):
        if off == 0:
            xs = win[:, :n_lanes]
        else:
            # shifted[i] = win[i + off]; wrap-around lands in the halo tail
            # (>= n_lanes) and is sliced away.  Static shift -> cheap XLU rotate.
            shift = (twin - off) if _ROLL_IS_FORWARD else off
            xs = pltpu.roll(win, shift, axis=1)[:, :n_lanes]
        part = jnp.dot(w_ref[j], xs, preferred_element_type=jnp.float32)
        acc = part if acc is None else acc + part
    return acc                              # (Cout, n_lanes) float32


def _conv_stats_kernel(x_ref, w_ref, mask_ref, y_ref, s1_ref, s2_ref, *,
                       offsets, n_lanes):
    """Conv tile + per-channel sum / sum^2 accumulation (bias omitted: a
    per-channel constant cancels exactly against the instance-norm mean)."""
    t = pl.program_id(1)
    acc = _conv_taps(x_ref, w_ref, offsets, n_lanes)

    @pl.when(t == 0)
    def _():
        s1_ref[...] = jnp.zeros_like(s1_ref)
        s2_ref[...] = jnp.zeros_like(s2_ref)

    m = mask_ref[...]                       # (1, T): 1.0 on valid output lanes
    am = acc * m
    s1_ref[0] += jnp.sum(am, axis=1, keepdims=True)
    s2_ref[0] += jnp.sum(am * acc, axis=1, keepdims=True)
    y_ref[0] = acc.astype(y_ref.dtype)


def _conv_bias_act_kernel(x_ref, w_ref, b_ref, y_ref, *, offsets, n_lanes, relu):
    acc = _conv_taps(x_ref, w_ref, offsets, n_lanes) + b_ref[...]
    if relu:
        acc = jnp.where(acc >= 0, acc, 0.2 * acc)
    y_ref[0] = acc.astype(y_ref.dtype)


# ---------------------------------------------------------------------------
# Pass 2 (instance norm only): fused normalize + affine + LeakyReLU, in place.
# ---------------------------------------------------------------------------
def _norm_act_kernel(y_ref, s1_ref, s2_ref, g_ref, b_ref, o_ref, *,
                     inv_count, relu):
    mean = s1_ref[0] * inv_count                         # (Cout, 1)
    # one-pass variance in f32; clamp tiny negatives from cancellation
    var = jnp.maximum(s2_ref[0] * inv_count - mean * mean, 0.0)
    scale = g_ref[...] * lax.rsqrt(var + 1e-5)           # EUP, effectively free
    shift = b_ref[...] - mean * scale
    y = y_ref[0] * scale + shift                         # single FMA-style pass
    if relu:
        y = jnp.where(y >= 0, y, 0.2 * y)
    o_ref[0] = y.astype(o_ref.dtype)


# ---------------------------------------------------------------------------
# Wrapper
# ---------------------------------------------------------------------------
@functools.partial(jax.jit, static_argnames=("kernel_size", "stride", "relu",
                                             "instance_norm", "tile_lanes"))
def conv_layer_forward(x, weight, bias, gamma, beta, *, kernel_size, stride,
                       relu=True, instance_norm=False, tile_lanes=4096):
    """x: NCHW f32, weight: (Cout, Cin, K, K), bias/gamma/beta: (Cout,)."""
    N, Cin, H, W = x.shape
    Cout = weight.shape[0]
    K, s = kernel_size, stride
    pad = K // 2

    # ---- glue (plain JAX, fused by XLA): reflection pad ----
    xp = jnp.pad(x, ((0, 0), (0, 0), (pad, pad), (pad, pad)), mode="reflect")
    Hp, Wp = H + 2 * pad, W + 2 * pad
    Ho = (Hp - K) // s + 1
    Wo = (Wp - K) // s + 1

    if s == 1:
        # 1x HBM read: taps are static lane shifts of the row-major flattened
        # padded image (row pitch Wp); output columns >= Wo are scrap.
        x_eff, c_eff, row_in, row_out = xp, Cin, Wp, Wp
        offsets = tuple(kh * Wp + kw for kh in range(K) for kw in range(K))
        w_taps = jnp.transpose(weight, (2, 3, 0, 1)).reshape(K * K, Cout, Cin)
    else:
        # Strided conv: gather the K width phases in the wrapper (K-fold, not
        # K*K-fold inflation); the K remaining row taps are lane shifts of the
        # gathered image, with an output row pitch of s*Wo (cols >= Wo = scrap).
        cols = [xp[:, :, :, kw:kw + s * Wo:s] for kw in range(K)]
        x_eff = jnp.stack(cols, axis=1).reshape(N, K * Cin, Hp, Wo)
        c_eff, row_in, row_out = K * Cin, Wo, s * Wo
        offsets = tuple(kh * Wo for kh in range(K))
        w_taps = (jnp.transpose(weight, (2, 3, 1, 0))      # (Kh, Kw, Cin, Cout)
                  .reshape(K, K * Cin, Cout).transpose(0, 2, 1))

    n_taps = len(offsets)
    lout = Ho * row_out                                    # flattened output len
    T = max(128, min(int(tile_lanes), _round_up(lout, 128)))
    n_tiles = -(-lout // T)
    lout_p = n_tiles * T
    off_max = max(offsets)
    twin = _round_up(T + off_max, 128)                     # tile + halo window
    lin_p = max((n_tiles - 1) * T + twin, Hp * row_in)
    c_pad = _round_up(c_eff, 8)

    x_flat = x_eff.reshape(N, c_eff, Hp * row_in)
    x_flat = jnp.pad(x_flat, ((0, 0), (0, c_pad - c_eff),
                              (0, lin_p - Hp * row_in)))
    # Per-tile halo'd windows -> every in-kernel tap shift has a static offset.
    xwin = jnp.stack([x_flat[:, :, t * T:t * T + twin] for t in range(n_tiles)],
                     axis=1)                               # (N, n_tiles, c_pad, twin)
    w_taps = jnp.pad(w_taps, ((0, 0), (0, 0), (0, c_pad - c_eff))).astype(jnp.float32)

    grid = (N, n_tiles)
    x_spec = pl.BlockSpec((1, 1, c_pad, twin), lambda n, t: (n, t, 0, 0))
    w_spec = pl.BlockSpec((n_taps, Cout, c_pad), lambda n, t: (0, 0, 0))
    y_spec = pl.BlockSpec((1, Cout, T), lambda n, t: (n, 0, t))
    stat_spec = pl.BlockSpec((1, Cout, 1), lambda n, t: (n, 0, 0))
    mask_spec = pl.BlockSpec((1, T), lambda n, t: (0, t))
    col_spec = pl.BlockSpec((Cout, 1), lambda n, t: (0, 0))

    cost = pl.CostEstimate(
        flops=int(2 * N * Ho * Wo * Cout * Cin * K * K),
        transcendentals=0,
        bytes_accessed=int(4 * (xwin.size + w_taps.size + N * Cout * lout_p)))
    vmem_est = 4 * (2 * c_pad * twin + 3 * Cout * T + 2 * n_taps * Cout * c_pad
                    + 2 * T + 8 * Cout)
    cparams = pltpu.CompilerParams(
        dimension_semantics=("parallel", "arbitrary"),      # N across cores
        vmem_limit_bytes=int(min(32 * 2 ** 20, max(16 * 2 ** 20, 4 * vmem_est))))

    y_shape = jax.ShapeDtypeStruct((N, Cout, lout_p), jnp.float32)
    stat_shape = jax.ShapeDtypeStruct((N, Cout, 1), jnp.float32)

    if instance_norm:
        pos = np.arange(lout_p)
        mask = jnp.asarray(((pos < lout) & (pos % row_out < Wo))[None, :],
                           dtype=jnp.float32)
        y, s1, s2 = pl.pallas_call(
            functools.partial(_conv_stats_kernel, offsets=offsets, n_lanes=T),
            grid_spec=pltpu.PrefetchScalarGridSpec(
                num_scalar_prefetch=0, grid=grid,
                in_specs=[x_spec, w_spec, mask_spec],
                out_specs=[y_spec, stat_spec, stat_spec]),
            out_shape=(y_shape, stat_shape, stat_shape),
            compiler_params=cparams, cost_estimate=cost,
        )(xwin, w_taps, mask)

        y = pl.pallas_call(
            functools.partial(_norm_act_kernel,
                              inv_count=1.0 / float(Ho * Wo), relu=relu),
            grid_spec=pltpu.PrefetchScalarGridSpec(
                num_scalar_prefetch=0, grid=grid,
                in_specs=[y_spec, stat_spec, stat_spec, col_spec, col_spec],
                out_specs=y_spec),
            out_shape=y_shape,
            compiler_params=cparams,
            input_output_aliases={0: 0},
        )(y, s1, s2,
          gamma.reshape(Cout, 1).astype(jnp.float32),
          beta.reshape(Cout, 1).astype(jnp.float32))
    else:
        y = pl.pallas_call(
            functools.partial(_conv_bias_act_kernel, offsets=offsets,
                              n_lanes=T, relu=relu),
            grid_spec=pltpu.PrefetchScalarGridSpec(
                num_scalar_prefetch=0, grid=grid,
                in_specs=[x_spec, w_spec, col_spec],
                out_specs=y_spec),
            out_shape=y_shape,
            compiler_params=cparams, cost_estimate=cost,
        )(xwin, w_taps, bias.reshape(Cout, 1).astype(jnp.float32))

    # (N, Cout, Ho*row_out) -> NCHW: free reshape, drop the scrap columns.
    return y[:, :, :lout].reshape(N, Cout, Ho, row_out)[:, :, :, :Wo]


# ---------------------------------------------------------------------------
# Reference + self-test
# ---------------------------------------------------------------------------
def _reference(x, weight, bias, gamma, beta, *, kernel_size, stride,
               relu=True, instance_norm=False):
    pad = kernel_size // 2
    xp = jnp.pad(x, ((0, 0), (0, 0), (pad, pad), (pad, pad)), mode="reflect")
    out = lax.conv_general_dilated(
        xp, weight, window_strides=(stride, stride), padding="VALID",
        dimension_numbers=("NCHW", "OIHW", "NCHW"))
    out = out + bias.reshape(1, -1, 1, 1)
    if instance_norm:
        mean = jnp.mean(out, axis=(2, 3), keepdims=True)
        var = jnp.mean((out - mean) ** 2, axis=(2, 3), keepdims=True)
        out = (out - mean) * lax.rsqrt(var + 1e-5)
        out = out * gamma.reshape(1, -1, 1, 1) + beta.reshape(1, -1, 1, 1)
    if relu:
        out = jnp.where(out > 0, out, 0.2 * out)
    return out


if __name__ == "__main__":
    key = jax.random.PRNGKey(0)
    kx, kw_key, kb_key = jax.random.split(key, 3)

    in_channels, out_channels = 4, 8
    x = jax.random.normal(kx, (2, in_channels, 16, 16), dtype=jnp.float32)
    weight = 0.1 * jax.random.normal(kw_key, (out_channels, in_channels, 3, 3),
                                     dtype=jnp.float32)
    bias = 0.05 * jax.random.normal(kb_key, (out_channels,), dtype=jnp.float32)
    gamma = jnp.ones((out_channels,), jnp.float32)   # InstanceNorm affine init
    beta = jnp.zeros((out_channels,), jnp.float32)

    def check(**cfg):
        out = jax.block_until_ready(
            conv_layer_forward(x, weight, bias, gamma, beta, **cfg))
        ref_cfg = {k: v for k, v in cfg.items() if k != "tile_lanes"}
        ref = _reference(x, weight, bias, gamma, beta, **ref_cfg)
        np.testing.assert_allclose(np.asarray(out), np.asarray(ref),
                                   rtol=5e-4, atol=5e-4)

    # ConvLayer(4, 8, kernel_size=3, stride=1, relu=True, instance_norm=True)
    check(kernel_size=3, stride=1, relu=True, instance_norm=True)
    # multi-tile spatial grid (exercises the tiled two-phase instance norm)
    check(kernel_size=3, stride=1, relu=True, instance_norm=True, tile_lanes=128)
    # no instance norm: bias + LeakyReLU fused into pass 1
    check(kernel_size=3, stride=1, relu=True, instance_norm=False)
    # strided variant (width-phase gather path)
    check(kernel_size=3, stride=2, relu=True, instance_norm=True)

    # TODO(synk): very large images would want halo'd manual-DMA input windows
    # instead of the wrapper-built per-tile windows used here.
    print("KERNEL_OK")
</pallas_src>

<mosaic_0001>
module attributes {stable_mosaic.version = 11 : i64} {
  func.func @k(%arg0: memref<8x128xf32, #tpu.memory_space<vmem>>, %arg1: memref<8x128xf32, #tpu.memory_space<vmem>>) attributes {dimension_semantics = [], scalar_prefetch = 0 : i64, scratch_operands = 0 : i64, tpu.core_type = #tpu.core_type<tc>} {
    %c0 = arith.constant 0 : index
    %c0_0 = arith.constant 0 : index
    %0 = vector.load %arg0[%c0, %c0_0] : memref<8x128xf32, #tpu.memory_space<vmem>>, vector<8x128xf32>
    %c1_i32 = arith.constant 1 : i32
    %1 = tpu.dynamic_rotate %0 by %c1_i32 dim 1 : vector<8x128xf32>, i32 -> vector<8x128xf32>
    %c0_1 = arith.constant 0 : index
    %c0_2 = arith.constant 0 : index
    %2 = vector.load %arg1[%c0_1, %c0_2] : memref<8x128xf32, #tpu.memory_space<vmem>>, vector<8x128xf32>
    tpu.vector_store %arg1[%c0_1, %c0_2], %1 {strides = array<i32>} : memref<8x128xf32, #tpu.memory_space<vmem>>, vector<8x128xf32>,
    return
  }
}

</mosaic_0001>

<bundles_post_ra>
// kernel: tpu_custom_call.1
= control target key start
LH: loop header
LB: loop body
LE: loop exit
PB: predicated region body
PF: predicated region fallthrough
CT: control target
= control target key end

     0   :  { %6 = vsyncpa [#allocation3], 0  ;;  %s106_s0 = inlined_call_operand.hbm [shape: f32[8,128], index: 0, kind: input, shape index: {}]   ;;  %s107_s1 = inlined_call_operand.hbm [shape: f32[8,128], index: 1, kind: output, shape index: {}]  }
   0x1   :  { %7 = vsyncpa [#allocation4], 0  ;;  %s87_s6 = smov [#allocation2]  }
   0x2   :  { %s14_s7 = sshll.u32 %s87_s6, 4  ;;  %s15_s7 = int_to_ptr.vmem [resolvable:$true] %s14_s7 }
   0x3   :  { %s51_s8 = scalar_lea.vmem %s15_s7, 128  ;;  %p56_p1 = scmp.lt.s32.totalorder %s15_s7, %s15_s7 }
   0x4   :  { %p52_p0 = scmp.ne.s32.totalorder %s15_s7, %s51_s8  ;;  %p57_p2 = scmp.lt.s32.totalorder %s51_s8, %s51_s8 }
   0x6   :  { %p58_p3 = por %p57_p2, %p56_p1 }
   0x8   :  { %p59_p4 = pnand %p58_p3, %p52_p0 }
   0xa   :  { %62 = shalt.err (!%p59_p4)
}
   0xb   :  { %17 = dma.hbm_to_vmem [thread:$0]  %s106_s0, 128, %s15_s7, [#allocation3]  }
   0xc   :  { %83 = dma.done.wait [#allocation3], 128  }
   0xd   :  { %84 = vsyncadd [#allocation3], 4294967168  ;;  %v21_v0 = vld [vmem:[#allocation2] sm:$0xff]  ;;  %s88_s11 = smov 1   ;;  %s89_s12 = smov [#allocation5]  }
   0xe   :  { %22 = vrot.lane.b32.xlu0 %v21_v0, %s88_s11  ;;  %s31_s13 = sshll.u32 %s89_s12, 4  ;;  %s32_s13 = int_to_ptr.vmem [resolvable:$true] %s31_s13 }
   0xf   :  { %s63_s14 = scalar_lea.vmem %s32_s13, 128  ;;  %p68_p6 = scmp.lt.s32.totalorder %s32_s13, %s32_s13 }
  0x10   :  { %p64_p5 = scmp.ne.s32.totalorder %s32_s13, %s63_s14  ;;  %p69_p7 = scmp.lt.s32.totalorder %s63_s14, %s63_s14 }
  0x12   :  { %p70_p8 = por %p69_p7, %p68_p6 }
  0x14   :  { %p71_p9 = pnand %p70_p8, %p64_p5 }
  0x80   :  { %v23_v1 = vpop.permute.xlu0 %22 }
  0x81   :  { %24 = vst [vmem:[#allocation5] sm:$0xff] %v23_v1 }
  0x82   :  { %74 = shalt.err (!%p71_p9)
}
  0x83   :  { %34 = dma.vmem_to_hbm [thread:$0]  %s32_s13, 128, %s107_s1, [#allocation4]  }
  0x84   :  { %85 = dma.done.wait [#allocation4], 128  }
  0x85   :  { %86 = vsyncadd [#allocation4], 4294967168 }
  0x86   :  { %38 = vsyncpa [#allocation3], 1 }
  0x87   :  { %39 = vsyncpa [#allocation4], 1 }

</bundles_post_ra>
